<compile_context>
chip_gen: v6e
topology: v6e:2x2x1
jax: 0.10.0
libtpu: 0.0.40
codegen_flags: <defaults>
</compile_context>

<pallas_src>
import jax
import jax.numpy as jnp
from jax import lax
from jax.experimental import pallas as pl
from jax.experimental.pallas import tpu as pltpu


def feedforward_kernel(x_ref, w1_ref, b1_ref, w2_ref, b2_ref, o_ref):
    # fc1: contract D_in of w1 [H, D_in] against D_in of x [tile, D_in]
    #      -> [H, tile] (MXU, f32 accumulate, batch on the lane axis).
    h = lax.dot_general(
        w1_ref[...], x_ref[...],
        dimension_numbers=(((1,), (1,)), ((), ())),
        preferred_element_type=jnp.float32,
    )
    h = h + b1_ref[...]                      # (H, 1) broadcast across lanes
    h = jnp.maximum(h, 0.0)                  # ReLU on the VPU

    # fc2 (output width 1): VPU multiply + sublane (XLU) reduce instead of a
    # degenerate N=1 MXU matmul.  Result is already lane-dense: (1, tile).
    out = jnp.sum(h * w2_ref[...], axis=0, keepdims=True)
    out = out + b2_ref[0, 0]                 # scalar bias from SMEM

    # Sigmoid (EUP exp + reciprocal), lane-dense store.
    o_ref[...] = jax.nn.sigmoid(out).astype(o_ref.dtype)


def feedforward(x, w1, b1, w2, b2, *, tile_b=2048):
    """Forward pass matching torch Feedforward.

    x:  [B, D_in]
    w1: [H, D_in]  (PyTorch fc1.weight layout, out x in)
    b1: [H]
    w2: [1, H]     (PyTorch fc2.weight layout)
    b2: [1]
    returns [B, 1]

    tile_b should be a multiple of 128.
    """
    B, D_in = x.shape
    H = w1.shape[0]
    dtype = x.dtype
    itemsize = jnp.dtype(dtype).itemsize

    # --- batch tile selection ------------------------------------------------
    if B <= 256:
        tile = B                               # single full-batch tile
    else:
        # >=2 grid steps (keeps v7x's 2nd TensorCore busy), lane-aligned,
        # capped at tile_b.
        half = pl.cdiv(B, 2)
        tile = min(tile_b, pl.cdiv(half, 128) * 128)
    num_tiles = pl.cdiv(B, tile)
    grid = (num_tiles,)

    # --- one-time (cheap) layout plumbing on the tiny params ------------------
    b1_col = b1.reshape(H, 1).astype(dtype)     # broadcast across lanes in-kernel
    w2_col = w2.reshape(H, 1).astype(dtype)     # (1, H) -> (H, 1)
    b2_s = b2.reshape(1, 1).astype(dtype)       # scalar, lives in SMEM

    # --- x pipeline depth ------------------------------------------------------
    n_x_buf = 2
    x_spec_kwargs = {}
    if num_tiles >= 3 and tile * D_in * itemsize < (128 << 10):
        # Tiny per-step transfers with many steps: deepen the x pipeline so DMA
        # issue latency hides behind the short compute.
        n_x_buf = 3
        x_spec_kwargs["pipeline_mode"] = pl.Buffered(3)

    # --- VMEM budget / compiler params ----------------------------------------
    def _pad(n, m):
        return ((n + m - 1) // m) * m

    vmem_bytes = itemsize * (
        n_x_buf * _pad(tile, 8) * _pad(D_in, 128)   # pipelined x tiles
        + 2 * _pad(H, 8) * _pad(D_in, 128)          # resident w1 (double-buffered)
        + 4 * _pad(H, 8) * 128                      # b1, w2 columns
        + 2 * 8 * _pad(tile, 128)                   # output tiles
        + _pad(H, 8) * _pad(tile, 128)              # [H, tile] intermediate
    )
    compiler_kwargs = dict(dimension_semantics=("parallel",))
    if vmem_bytes > (16 << 20):
        # Don't let the conservative default scoped-VMEM limit (16 MiB on v5e,
        # 32 MiB on v6e/v7x) bite before physical VMEM does.
        compiler_kwargs["vmem_limit_bytes"] = int(min(2 * vmem_bytes, 96 << 20))
    # TODO(synk): for very large H*D_in (resident w1 approaching v7x's 64 MiB
    # VMEM), add a D_in (K) grid axis marked "arbitrary" with an f32 VMEM
    # accumulator scratch; unnecessary at these layer sizes.

    bytes_accessed = int(
        (x.size + w1.size + b1_col.size + w2_col.size + b2_s.size + B) * itemsize
    )

    out_row = pl.pallas_call(
        feedforward_kernel,
        out_shape=jax.ShapeDtypeStruct((1, B), dtype),
        grid=grid,
        in_specs=[
            # x in natural [B, D_in] layout, tiled (and pipelined) along batch.
            pl.BlockSpec((tile, D_in), lambda i: (i, 0), **x_spec_kwargs),
            # Weights / biases stay VMEM-resident across all grid iterations.
            pl.BlockSpec((H, D_in), lambda i: (0, 0)),
            pl.BlockSpec((H, 1), lambda i: (0, 0)),
            pl.BlockSpec((H, 1), lambda i: (0, 0)),
            # b2 is a single scalar: keep it in SMEM, not a padded VMEM tile.
            pl.BlockSpec(memory_space=pltpu.MemorySpace.SMEM),
        ],
        out_specs=pl.BlockSpec((1, tile), lambda i: (0, i)),
        compiler_params=pltpu.CompilerParams(**compiler_kwargs),
        cost_estimate=pl.CostEstimate(
            flops=int(2 * B * H * (D_in + 1) + 2 * B),
            transcendentals=int(B),
            bytes_accessed=bytes_accessed,
        ),
    )(x, w1, b1_col, w2_col, b2_s)

    # (1, B) lane-dense row -> [B, 1] column, matching the PyTorch output.
    return out_row.reshape(B, 1)


def init_params(key, input_size, hidden_size, dtype=jnp.float32):
    """Deterministic init matching PyTorch Linear's U(-1/sqrt(fan_in), 1/sqrt(fan_in)),
    stored in PyTorch layout (weight = [out_features, in_features])."""
    k1, k2, k3, k4 = jax.random.split(key, 4)
    bound1 = 1.0 / (input_size ** 0.5)
    bound2 = 1.0 / (hidden_size ** 0.5)
    w1 = jax.random.uniform(k1, (hidden_size, input_size), dtype, -bound1, bound1)
    b1 = jax.random.uniform(k2, (hidden_size,), dtype, -bound1, bound1)
    w2 = jax.random.uniform(k3, (1, hidden_size), dtype, -bound2, bound2)
    b2 = jax.random.uniform(k4, (1,), dtype, -bound2, bound2)
    return w1, b1, w2, b2


if __name__ == "__main__":
    input_size = 16
    hidden_size = 32
    batch = 8

    key = jax.random.PRNGKey(0)
    kx, kp = jax.random.split(key)
    x = jax.random.normal(kx, (batch, input_size), jnp.float32)
    w1, b1, w2, b2 = init_params(kp, input_size, hidden_size)

    out = feedforward(x, w1, b1, w2, b2)
    out = jax.block_until_ready(out)

    # Reference check in plain JAX (same math as the PyTorch forward).
    ref = jax.nn.sigmoid(jnp.maximum(x @ w1.T + b1, 0.0) @ w2.T + b2)
    assert out.shape == (batch, 1)
    assert jnp.allclose(out, ref, atol=1e-5, rtol=1e-5)

    print("KERNEL_OK")
</pallas_src>

<mosaic_0001>
module attributes {stable_mosaic.version = 11 : i64} {
  func.func @feedforward_kernel(%arg0: i32, %arg1: memref<8x16xf32, #tpu.memory_space<vmem>>, %arg2: memref<32x16xf32, #tpu.memory_space<vmem>>, %arg3: memref<32x1xf32, #tpu.memory_space<vmem>>, %arg4: memref<32x1xf32, #tpu.memory_space<vmem>>, %arg5: memref<1x1xf32, #tpu.memory_space<smem>>, %arg6: memref<1x8xf32, #tpu.memory_space<vmem>>) attributes {dimension_semantics = [#tpu.dimension_semantics<parallel>], iteration_bounds = array<i64: 1>, scalar_prefetch = 0 : i64, scratch_operands = 0 : i64, tpu.core_type = #tpu.core_type<tc>, window_params = [{transform_indices = @transform_0, window_bounds = array<i64: 8, 16>}, {pipeline_mode = #tpu.pipeline_mode<synchronous>, transform_indices = @transform_1, window_bounds = array<i64: 32, 16>}, {pipeline_mode = #tpu.pipeline_mode<synchronous>, transform_indices = @transform_2, window_bounds = array<i64: 32, 1>}, {pipeline_mode = #tpu.pipeline_mode<synchronous>, transform_indices = @transform_3, window_bounds = array<i64: 32, 1>}, {transform_indices = @transform_4, window_bounds = array<i64: 1, 1>}, {transform_indices = @transform_5, window_bounds = array<i64: 1, 8>}]} {
    %c0 = arith.constant 0 : index
    %c0_0 = arith.constant 0 : index
    %0 = vector.load %arg2[%c0, %c0_0] : memref<32x16xf32, #tpu.memory_space<vmem>>, vector<32x16xf32>
    %c0_1 = arith.constant 0 : index
    %c0_2 = arith.constant 0 : index
    %1 = vector.load %arg1[%c0_1, %c0_2] : memref<8x16xf32, #tpu.memory_space<vmem>>, vector<8x16xf32>
    %cst = arith.constant dense<0.000000e+00> : vector<32x8xf32>
    %2 = tpu.matmul %0, %1, %cst {dimension_numbers = #tpu.dot_dimension_numbers<[1], [1], [0], [0], [0, 0, 1, 0], [], []>} : vector<32x16xf32>, vector<8x16xf32>, vector<32x8xf32> -> vector<32x8xf32>
    %c0_3 = arith.constant 0 : index
    %c0_4 = arith.constant 0 : index
    %3 = vector.load %arg3[%c0_3, %c0_4] : memref<32x1xf32, #tpu.memory_space<vmem>>, vector<32x1xf32>
    %4 = vector.broadcast %3 : vector<32x1xf32> to vector<32x8xf32>
    %5 = arith.addf %2, %4 : vector<32x8xf32>
    %cst_5 = arith.constant 0.000000e+00 : f32
    %6 = vector.broadcast %cst_5 : f32 to vector<32x8xf32>
    %7 = arith.maximumf %5, %6 : vector<32x8xf32>
    %c0_6 = arith.constant 0 : index
    %c0_7 = arith.constant 0 : index
    %8 = vector.load %arg4[%c0_6, %c0_7] : memref<32x1xf32, #tpu.memory_space<vmem>>, vector<32x1xf32>
    %9 = vector.broadcast %8 : vector<32x1xf32> to vector<32x8xf32>
    %10 = arith.mulf %7, %9 : vector<32x8xf32>
    %cst_8 = arith.constant dense<0.000000e+00> : vector<8xf32>
    %11 = vector.multi_reduction <add>, %10, %cst_8 [0] : vector<32x8xf32> to vector<8xf32>
    %12 = vector.shape_cast %11 : vector<8xf32> to vector<1x8xf32>
    %c0_9 = arith.constant 0 : index
    %c0_10 = arith.constant 0 : index
    %13 = memref.load %arg5[%c0_9, %c0_10] : memref<1x1xf32, #tpu.memory_space<smem>>
    %14 = vector.broadcast %13 : f32 to vector<1x8xf32>
    %15 = arith.addf %12, %14 : vector<1x8xf32>
    %16 = arith.negf %15 : vector<1x8xf32>
    %17 = math.exp %16 : vector<1x8xf32>
    %cst_11 = arith.constant 1.000000e+00 : f32
    %18 = vector.broadcast %cst_11 : f32 to vector<1x8xf32>
    %19 = arith.addf %18, %17 : vector<1x8xf32>
    %20 = arith.divf %18, %19 : vector<1x8xf32>
    %c0_12 = arith.constant 0 : index
    %c0_13 = arith.constant 0 : index
    %21 = vector.load %arg6[%c0_12, %c0_13] : memref<1x8xf32, #tpu.memory_space<vmem>>, vector<1x8xf32>
    tpu.vector_store %arg6[%c0_12, %c0_13], %20 {strides = array<i32>} : memref<1x8xf32, #tpu.memory_space<vmem>>, vector<1x8xf32>,
    return
  }
  func.func @transform_0(%arg0: i32) -> (i32, i32) {
    %c0_i32 = arith.constant 0 : i32
    %c0_i32_0 = arith.constant 0 : i32
    return %arg0, %c0_i32 : i32, i32
  }
  func.func @transform_1(%arg0: i32) -> (i32, i32) {
    %c0_i32 = arith.constant 0 : i32
    %c0_i32_0 = arith.constant 0 : i32
    %c0_i32_1 = arith.constant 0 : i32
    return %c0_i32, %c0_i32_0 : i32, i32
  }
  func.func @transform_2(%arg0: i32) -> (i32, i32) {
    %c0_i32 = arith.constant 0 : i32
    %c0_i32_0 = arith.constant 0 : i32
    %c0_i32_1 = arith.constant 0 : i32
    return %c0_i32, %c0_i32_0 : i32, i32
  }
  func.func @transform_3(%arg0: i32) -> (i32, i32) {
    %c0_i32 = arith.constant 0 : i32
    %c0_i32_0 = arith.constant 0 : i32
    %c0_i32_1 = arith.constant 0 : i32
    return %c0_i32, %c0_i32_0 : i32, i32
  }
  func.func @transform_4(%arg0: i32) -> (i32, i32) {
    %c0_i32 = arith.constant 0 : i32
    %c0_i32_0 = arith.constant 0 : i32
    %c0_i32_1 = arith.constant 0 : i32
    return %c0_i32, %c0_i32_0 : i32, i32
  }
  func.func @transform_5(%arg0: i32) -> (i32, i32) {
    %c0_i32 = arith.constant 0 : i32
    %c0_i32_0 = arith.constant 0 : i32
    return %c0_i32, %arg0 : i32, i32
  }
}

</mosaic_0001>

<bundles_post_ra>
// kernel: tpu_custom_call.1
= control target key start
LH: loop header
LB: loop body
LE: loop exit
PB: predicated region body
PF: predicated region fallthrough
CT: control target
= control target key end

     0   :  { %vm51_vm0 = vcmask 130048   ;;  %v274_v7 = vmov 0   ;;  %s359_s0 = inlined_call_operand.vmem [shape: f32[8,16], index: 0, kind: input, shape index: {}]   ;;  %s360_s1 = inlined_call_operand.vmem [shape: f32[32,16], index: 1, kind: input, shape index: {}]   ;;  %s361_s2 = inlined_call_operand.vmem [shape: f32[32,1], index: 2, kind: input, shape index: {}]   ;;  %s362_s3 = inlined_call_operand.vmem [shape: f32[32,1], index: 3, kind: input, shape index: {}]   ;;  %s363_s4 = inlined_call_operand.<no memory space> [shape: f32[1,1], index: 4, kind: input, shape index: {}]   ;;  %s364_s5 = inlined_call_operand.hbm [shape: f32[1,8], index: 5, kind: output, shape index: {}]  }
   0x1   :  { %v26_v0 = vld [vmem:[%s359_s0] sm:$0xff]  ;;  %v24_v2 = vld [vmem:[%s360_s1 + $0x10] sm:$0xff]  ;;  %v23_v3 = vld [vmem:[%s360_s1 + $0x8] sm:$0xff]  ;;  %246 = vset.pattern.permute.xlu0 %v274_v7  ;;  %247 = vset.pattern.permute.xlu1 %v274_v7 }
   0x2   :  { %v22_v1 = vld [vmem:[%s360_s1] sm:$0xff]  ;;  %234 = vmatprep.subr.msk.mxu0 %vm51_vm0, %v26_v0  ;;  %242 = vmatprep.subr.msk.mxu1 %vm51_vm0, %v26_v0  ;;  %v25_v4 = vld [vmem:[%s360_s1 + $0x18] sm:$0xff]  ;;  %v29_v6 = vld [vmem:[%s361_s2 + $0x10] sm:$0xff] }
   0x3   :  { %235 = vmatpush3.xpose.msk.msra.mxu0 %vm51_vm0, %v26_v0  ;;  %243 = vmatpush3.xpose.msk.msra.mxu1 %vm51_vm0, %v26_v0  ;;  %v27_v5 = vld [vmem:[%s361_s2] sm:$0xff] }
   0x4   :  { %236 = vmatprep.mubr.msk.f32.mxu0 %vm51_vm0, %v22_v1  ;;  %239 = vmatprep.mubr.msk.f32.mxu1 %vm51_vm0, %v24_v2 }
   0x5   :  { %11 = vsyncpa [#allocation4], 0  ;;  %33 = vperm.xlu0 %246, %v27_v5   ;;  %43 = vperm.xlu1 %247, %v29_v6   ;;  %v28_v8 = vld [vmem:[%s361_s2 + $0x8] sm:$0xff]  ;;  %v30_v9 = vld [vmem:[%s361_s2 + $0x18] sm:$0xff]  ;;  %vm184_vm1 = vcmask 64512   ;;  %v199_v50 = vstv %s363_s4  ;;  %s275_s17 = smov [#allocation3]  }
   0x6   :  { %237 = vmatmul.mubr.msk.f32.vlgmr.msra.gmra.mxu0 %vm51_vm0, %v23_v3  ;;  %240 = vmatmul.mubr.msk.f32.vlgmr.msra.gmra.mxu1 %vm51_vm0, %v25_v4  ;;  %v156_v10 = vld [vmem:[%s362_s3] sm:$0xff]  ;;  %v157_v11 = vld [vmem:[%s362_s3 + $0x8] sm:$0xff]  ;;  %v158_v12 = vld [vmem:[%s362_s3 + $0x10] sm:$0xff]  ;;  %s215_s18 = sshll.u32 %s275_s17, 4  ;;  %vm207_vm2 = vcmask 57344   ;;  %s216_s18 = int_to_ptr.vmem [resolvable:$true] %s215_s18 }
   0x7   :  { %v159_v13 = vld [vmem:[%s362_s3 + $0x18] sm:$0xff]  ;;  %s252_s19 = scalar_lea.vmem %s216_s18, 16  ;;  %s256_s20 = scalar_lea.vmem %s216_s18, 32 }
   0x8   :  { %p253_p0 = scmp.ne.s32.totalorder %s216_s18, %s252_s19  ;;  %p257_p1 = scmp.lt.s32.totalorder %s216_s18, %s216_s18 }
   0x9   :  { %38 = vperm.xlu0 %246, %v28_v8   ;;  %48 = vperm.xlu1 %247, %v30_v9   ;;  %p258_p2 = scmp.lt.s32.totalorder %s256_s20, %s252_s19 }
   0xb   :  { %p259_p3 = por %p258_p2, %p257_p1 }
   0xd   :  { %162 = vperm.xlu0 %246, %v156_v10   ;;  %167 = vperm.xlu1 %247, %v157_v11   ;;  %p260_p4 = pnand %p259_p3, %p253_p0 }
  0x11   :  { %172 = vperm.xlu0 %246, %v158_v12   ;;  %177 = vperm.xlu1 %247, %v159_v13  }
  0x80   :  { %v34_v14 = vpop.permute.xlu0 %33  ;;  %v44_v15 = vpop.permute.xlu1 %43 }
  0x84   :  { %v39_v16 = vpop.permute.xlu0 %38  ;;  %v49_v17 = vpop.permute.xlu1 %48 }
  0x88   :  { %v163_v18 = vpop.permute.xlu0 %162  ;;  %v168_v21 = vpop.permute.xlu1 %167 }
  0x8c   :  { %v173_v33 = vpop.permute.xlu0 %172  ;;  %v178_v36 = vpop.permute.xlu1 %177 }
  0xc6   :  { %v238_v19 = vpop.f32.mrf.mxu0  ;;  %v241_v20 = vpop.f32.mrf.mxu1 }
  0xc7   :  { %v139_v22 = vadd.f32 %v238_v19, %v39_v16  ;;  %v149_v23 = vadd.f32 %v241_v20, %v49_v17 }
  0xc8   :  { %v133_v24 = vpop.f32.mrf.mxu0  ;;  %v143_v25 = vpop.f32.mrf.mxu1 }
  0xc9   :  { %v153_v26 = vmax.f32 %v139_v22, 0.0  ;;  %v134_v27 = vadd.f32 %v133_v24, %v34_v14  ;;  %v144_v28 = vadd.f32 %v143_v25, %v44_v15  ;;  %v155_v30 = vmax.f32 %v149_v23, 0.0 }
  0xcb   :  { %v181_v29 = vmul.f32 %v168_v21, %v153_v26  ;;  %v152_v31 = vmax.f32 %v134_v27, 0.0  ;;  %v154_v32 = vmax.f32 %v144_v28, 0.0  ;;  %v183_v38 = vmul.f32 %v178_v36, %v155_v30 }
  0xcd   :  { %v180_v34 = vmul.f32 %v163_v18, %v152_v31  ;;  %v182_v35 = vmul.f32 %v173_v33, %v154_v32  ;;  %v186_v37 = vsel %vm184_vm1, %v181_v29, 0.0  ;;  %v190_v43 = vsel %vm184_vm1, %v183_v38, 0.0 }
  0xcf   :  { %v185_v39 = vsel %vm184_vm1, %v180_v34, 0.0  ;;  %v188_v41 = vsel %vm184_vm1, %v182_v35, 0.0 }
  0xd0   :  { %v187_v40 = vadd.f32 %v186_v37, %v185_v39 }
  0xd2   :  { %v189_v42 = vadd.f32 %v188_v41, %v187_v40 }
  0xd4   :  { %v191_v44 = vadd.f32 %v190_v43, %v189_v42 }
  0xd6   :  { %v192_v45 = vrot.slane %v191_v44, 4 }
  0xd8   :  { %v193_v46 = vadd.f32 %v192_v45, %v191_v44 }
  0xda   :  { %v194_v47 = vrot.slane %v193_v46, 2 }
  0xdc   :  { %v195_v48 = vadd.f32 %v194_v47, %v193_v46 }
  0xde   :  { %v196_v49 = vrot.slane %v195_v48, 1 }
  0xe0   :  { %v197_v51 = vadd.f32 %v196_v49, %v195_v48 }
  0xe2   :  { %v200_v52 = vadd.f32 %v199_v50, %v197_v51 }
  0xe4   :  { %v228_v53 = vmul.f32 -1.442695, %v200_v52 }
  0xe6   :  { %248 = vpow2.f32 %v228_v53 }
  0xf3   :  { %v249_v54 = vpop.eup %248 }
  0xf4   :  { %v204_v55 = vadd.f32 1.0, %v249_v54 }
  0xf6   :  { %250 = vrcp.f32 %v204_v55 }
 0x103   :  { %v251_v56 = vpop.eup %250 }
 0x104   :  { %208 = vst.msk [vmem:[#allocation3] sm:$0x1] %vm207_vm2, %v251_v56 }
 0x105   :  { %263 = shalt.err (!%p260_p4)
}
 0x106   :  { %218 = dma.vmem_to_hbm [thread:$0]  %s216_s18, 16, %s364_s5, [#allocation4]  }
 0x107   :  { %272 = dma.done.wait [#allocation4], 16  }
 0x108   :  { %273 = vsyncadd [#allocation4], 4294967280 }
 0x109   :  { %222 = vsyncpa [#allocation4], 1 }

</bundles_post_ra>
